<compile_context>
chip_gen: v7x
topology: tpu7x:2x2x1
jax: 0.10.0
libtpu: 0.0.40
codegen_flags: <defaults>
</compile_context>

<pallas_src>
import functools
import math

import jax
import jax.numpy as jnp
from jax.experimental import pallas as pl
from jax.experimental.pallas import tpu as pltpu


def _policy_layer_kernel(x_ref, w_ref, p_ref, o_ref, *, e_chunk, w_resident):
    """One (batch tile, expert chunk) step.

    x_ref: (E_CHUNK, TB, D) bf16      w_ref: (E_CHUNK or n, D, D) bf16
    p_ref: (E_CHUNK, TB, n) f32       o_ref: (TB, n, D) f32 (resident accumulator)
    """
    ec = pl.program_id(1)

    # Sum the chunk's contributions first, then touch the (TB, n, D) accumulator
    # exactly once per grid step (the accumulator RMW is the binding slot).
    contrib = None
    for e in range(e_chunk):
        x_e = x_ref[e]                                   # (TB, D) bf16
        if w_resident:
            # Whole weight tensor is VMEM-resident; pick this expert's (D, D).
            w_e = w_ref[ec * e_chunk + e]
        else:
            w_e = w_ref[e]
        # Per-expert matmul with a real M dimension (TB rows) -> MXU friendly.
        y = jnp.dot(x_e, w_e, preferred_element_type=jnp.float32)   # (TB, D) f32
        y = jnp.maximum(y, 0.0)                                      # ReLU
        # Routing mix folded into the expert reduction as a broadcast-MAC:
        #   contrib[t, i, :] += p[t, i, e] * y[t, :]
        # TODO(synk): p has n on the lane axis here; confirm in the bundle dump that
        # the (TB, n) -> (TB, n, D) broadcast does not emit per-step XLU relayouts
        # (volume is only TB*n values per expert, but worth verifying on v6e/v7x).
        c = p_ref[e][:, :, None] * y[:, None, :]                     # (TB, n, D) f32
        contrib = c if contrib is None else contrib + c

    @pl.when(ec == 0)
    def _first_chunk():
        o_ref[...] = contrib          # direct write: no zero-init store + reload

    @pl.when(ec != 0)
    def _accumulate():
        o_ref[...] += contrib


def _round_up(v, m):
    return ((v + m - 1) // m) * m


def _tpu_vmem_bytes():
    """Physical per-core VMEM; conservative (v7x-sized) fallback if unknown."""
    try:
        info = pltpu.get_tpu_info()
        cap = getattr(info, "vmem_capacity_bytes", None)
        if cap:
            return int(cap)
    except Exception:
        pass
    return 64 << 20


def _vmem_estimate(tb, e_chunk, n, D, w_resident):
    x_blk = 2 * e_chunk * tb * D * 2                        # bf16, double-buffered
    w_blk = 2 * (n if w_resident else e_chunk) * D * D * 2  # bf16
    p_blk = 2 * e_chunk * tb * n * 4                        # f32, double-buffered
    o_blk = 2 * tb * n * D * 4                              # f32 output / accumulator
    tmp = tb * n * D * 4 + e_chunk * tb * D * 4             # y / elementwise temps
    return x_blk + w_blk + p_blk + o_blk + tmp


def base_policy_layer(x, p_l_softmax, weight):
    """
    x:           (BS, n, D)                 float32
    p_l_softmax: (BS, n, n)                 float32
    weight:      (n, D, D) or (1, n, D, D)  float32
    returns:     (BS, n, D) in x.dtype
    """
    if weight.ndim == 4:
        weight = weight[0]
    BS, n, D = x.shape
    assert weight.shape == (n, D, D)
    assert p_l_softmax.shape == (BS, n, n)

    phys_vmem = _tpu_vmem_bytes()
    vmem_cap = min(int(phys_vmem * 3 // 4), 100 << 20)      # ~25% headroom for Mosaic
    two_core_likely = phys_vmem <= (64 << 20)               # v7x-like: 64 MiB, 2 TCs

    # ---- batch tile --------------------------------------------------------
    tb = 512 if phys_vmem >= (96 << 20) else 256            # bigger tiles on v5e/v6e
    if two_core_likely:
        # At least 2 batch tiles so the "parallel" axis can shard across both cores.
        tb = min(tb, max(8, _round_up(pl.cdiv(BS, 2), 8)))
    tb = min(tb, _round_up(BS, 8))                          # never bigger than batch
    tb = max(8, (tb // 8) * 8)                              # sublane-aligned always

    # ---- expert chunk ------------------------------------------------------
    # Largest divisor of n that is <= 8 (amortizes the accumulator RMW).
    # TODO(synk): for n with no divisor in [2, 8] (e.g. prime n > 8) this falls back
    # to per-expert steps; padding the expert axis would recover chunking.
    divisors = [d for d in range(1, min(n, 8) + 1) if n % d == 0]
    e_chunk = divisors[-1]

    # Whole-weight residency (stops re-streaming n*D*D bytes per batch tile).
    w_resident = 2 * n * D * D * 2 <= min(8 << 20, vmem_cap // 4)

    # Fit the VMEM budget: shrink the expert chunk first, tb (MXU M dim) last.
    while _vmem_estimate(tb, e_chunk, n, D, w_resident) > vmem_cap and len(divisors) > 1:
        divisors.pop()
        e_chunk = divisors[-1]
    while _vmem_estimate(tb, e_chunk, n, D, w_resident) > vmem_cap and tb > 8:
        tb = max(8, ((tb // 2) // 8) * 8)

    n_ec = n // e_chunk
    if n_ec == 1:
        # Single chunk == whole weight tensor; the constant index_map of the chunked
        # spec already keeps it resident without the dynamic-index path.
        w_resident = False
    bs_pad = _round_up(BS, tb)
    n_bt = bs_pad // tb

    # ---- operand layout ----------------------------------------------------
    # bf16 inputs for HBM traffic / MXU rate, f32 accumulation in-kernel.
    # Cast BEFORE the transpose to halve that wrapper HBM pass.  p stays f32 so the
    # routing mix keeps full precision.
    x_t = jnp.transpose(x.astype(jnp.bfloat16), (1, 0, 2))            # (n, BS, D)
    w_b = weight.astype(jnp.bfloat16)                                  # (n, D, D)
    p_t = jnp.transpose(p_l_softmax.astype(jnp.float32), (2, 0, 1))    # (n_e, BS, n_i)

    if bs_pad != BS:
        pad = bs_pad - BS
        x_t = jnp.pad(x_t, ((0, 0), (0, pad), (0, 0)))
        p_t = jnp.pad(p_t, ((0, 0), (0, pad), (0, 0)))

    flops = 2 * bs_pad * n * D * D + 2 * bs_pad * n * n * D
    w_streams = 1 if (w_resident or n_ec == 1) else n_bt
    bytes_accessed = (x_t.size * 2 + w_streams * w_b.size * 2
                      + p_t.size * 4 + bs_pad * n * D * 4)

    est = _vmem_estimate(tb, e_chunk, n, D, w_resident)
    vmem_limit = int(min(vmem_cap, max(32 << 20, int(est * 1.25))))

    w_spec = (pl.BlockSpec((n, D, D), lambda bt, ec: (0, 0, 0)) if w_resident
              else pl.BlockSpec((e_chunk, D, D), lambda bt, ec: (ec, 0, 0)))

    kernel = functools.partial(_policy_layer_kernel,
                               e_chunk=e_chunk, w_resident=w_resident)

    out = pl.pallas_call(
        kernel,
        out_shape=jax.ShapeDtypeStruct((bs_pad, n, D), jnp.float32),
        grid_spec=pltpu.PrefetchScalarGridSpec(
            num_scalar_prefetch=0,
            grid=(n_bt, n_ec),                    # (batch tiles, expert chunks)
            in_specs=[
                pl.BlockSpec((e_chunk, tb, D), lambda bt, ec: (ec, bt, 0)),   # x
                w_spec,                                                       # weight
                pl.BlockSpec((e_chunk, tb, n), lambda bt, ec: (ec, bt, 0)),   # p
            ],
            out_specs=pl.BlockSpec((tb, n, D), lambda bt, ec: (bt, 0, 0)),
        ),
        compiler_params=pltpu.CompilerParams(
            dimension_semantics=("parallel", "arbitrary"),
            vmem_limit_bytes=vmem_limit,
        ),
        cost_estimate=pl.CostEstimate(
            flops=int(flops), transcendentals=0, bytes_accessed=int(bytes_accessed)),
    )(x_t, w_b, p_t)

    return out[:BS].astype(x.dtype)


def _reference(x, p_l_softmax, weight):
    # Reference on the bf16-quantized operands (the kernel casts x / weight to bf16
    # and accumulates in f32), so the comparison isolates kernel correctness.
    if weight.ndim == 4:
        weight = weight[0]
    xq = x.astype(jnp.bfloat16).astype(jnp.float32)
    wq = weight.astype(jnp.bfloat16).astype(jnp.float32)
    y = jnp.maximum(jnp.einsum("bik,ikd->bid", xq, wq), 0.0)
    return jnp.einsum("bie,bed->bid", p_l_softmax, y)


if __name__ == "__main__":
    def _run_case(key, BS, n, D):
        kx, kp, kw = jax.random.split(key, 3)
        x = jax.random.normal(kx, (BS, n, D), dtype=jnp.float32)
        p_l_softmax = jax.nn.softmax(
            jax.random.normal(kp, (BS, n, n), dtype=jnp.float32), axis=-1)
        # kaiming_uniform_(a=sqrt(5)) on a (1, n, D, D) tensor:
        # fan_in = n * D * D, bound = 1 / sqrt(fan_in).
        bound = 1.0 / math.sqrt(n * D * D)
        weight = jax.random.uniform(kw, (n, D, D), dtype=jnp.float32,
                                    minval=-bound, maxval=bound)

        out = jax.block_until_ready(base_policy_layer(x, p_l_softmax, weight))
        ref = _reference(x, p_l_softmax, weight)
        assert out.shape == (BS, n, D)
        assert out.dtype == x.dtype
        assert jnp.allclose(out, ref, atol=1e-4, rtol=1e-3), (
            f"mismatch vs JAX reference at BS={BS}, n={n}, D={D}")

    root = jax.random.PRNGKey(0)
    # Module-scale smoke test (single expert chunk, single batch tile).
    _run_case(jax.random.fold_in(root, 0), BS=2, n=4, D=32)
    # Exercises expert-axis chunking, in-place accumulation across chunks,
    # batch padding, and the resident-weight path.
    _run_case(jax.random.fold_in(root, 1), BS=20, n=12, D=128)
    print("KERNEL_OK")
</pallas_src>

<mosaic_0001>
module attributes {stable_mosaic.version = 11 : i64} {
  func.func @_policy_layer_kernel(%arg0: i32, %arg1: i32, %arg2: memref<4x8x32xbf16, #tpu.memory_space<vmem>>, %arg3: memref<4x32x32xbf16, #tpu.memory_space<vmem>>, %arg4: memref<4x8x4xf32, #tpu.memory_space<vmem>>, %arg5: memref<8x4x32xf32, #tpu.memory_space<vmem>>) attributes {dimension_semantics = [#tpu.dimension_semantics<parallel>, #tpu.dimension_semantics<arbitrary>], iteration_bounds = array<i64: 1, 1>, scalar_prefetch = 0 : i64, scratch_operands = 0 : i64, tpu.core_type = #tpu.core_type<tc>, window_params = [{transform_indices = @transform_0, window_bounds = array<i64: 4, 8, 32>}, {transform_indices = @transform_1, window_bounds = array<i64: 4, 32, 32>}, {transform_indices = @transform_2, window_bounds = array<i64: 4, 8, 4>}, {transform_indices = @transform_3, window_bounds = array<i64: 8, 4, 32>}]} {
    %c0 = arith.constant 0 : index
    %c0_0 = arith.constant 0 : index
    %c0_1 = arith.constant 0 : index
    %0 = vector.load %arg2[%c0, %c0_0, %c0_1] : memref<4x8x32xbf16, #tpu.memory_space<vmem>>, vector<1x8x32xbf16>
    %1 = vector.shape_cast %0 : vector<1x8x32xbf16> to vector<8x32xbf16>
    %c0_2 = arith.constant 0 : index
    %c0_3 = arith.constant 0 : index
    %c0_4 = arith.constant 0 : index
    %2 = vector.load %arg3[%c0_2, %c0_3, %c0_4] : memref<4x32x32xbf16, #tpu.memory_space<vmem>>, vector<1x32x32xbf16>
    %3 = vector.shape_cast %2 : vector<1x32x32xbf16> to vector<32x32xbf16>
    %cst = arith.constant dense<0.000000e+00> : vector<8x32xf32>
    %4 = tpu.matmul %1, %3, %cst {dimension_numbers = #tpu.dot_dimension_numbers<[1], [0], [0], [1], [0, 0, 1, 1], [], []>} : vector<8x32xbf16>, vector<32x32xbf16>, vector<8x32xf32> -> vector<8x32xf32>
    %cst_5 = arith.constant 0.000000e+00 : f32
    %5 = vector.broadcast %cst_5 : f32 to vector<8x32xf32>
    %6 = arith.maximumf %4, %5 : vector<8x32xf32>
    %c0_6 = arith.constant 0 : index
    %c0_7 = arith.constant 0 : index
    %c0_8 = arith.constant 0 : index
    %7 = vector.load %arg4[%c0_6, %c0_7, %c0_8] : memref<4x8x4xf32, #tpu.memory_space<vmem>>, vector<1x8x4xf32>
    %8 = vector.shape_cast %7 : vector<1x8x4xf32> to vector<8x4xf32>
    %9 = vector.shape_cast %8 : vector<8x4xf32> to vector<8x4x1xf32>
    %10 = vector.shape_cast %6 : vector<8x32xf32> to vector<8x1x32xf32>
    %11 = vector.broadcast %9 : vector<8x4x1xf32> to vector<8x4x32xf32>
    %12 = vector.broadcast %10 : vector<8x1x32xf32> to vector<8x4x32xf32>
    %13 = arith.mulf %11, %12 : vector<8x4x32xf32>
    %c1 = arith.constant 1 : index
    %c0_9 = arith.constant 0 : index
    %c0_10 = arith.constant 0 : index
    %14 = vector.load %arg2[%c1, %c0_9, %c0_10] : memref<4x8x32xbf16, #tpu.memory_space<vmem>>, vector<1x8x32xbf16>
    %15 = vector.shape_cast %14 : vector<1x8x32xbf16> to vector<8x32xbf16>
    %c1_11 = arith.constant 1 : index
    %c0_12 = arith.constant 0 : index
    %c0_13 = arith.constant 0 : index
    %16 = vector.load %arg3[%c1_11, %c0_12, %c0_13] : memref<4x32x32xbf16, #tpu.memory_space<vmem>>, vector<1x32x32xbf16>
    %17 = vector.shape_cast %16 : vector<1x32x32xbf16> to vector<32x32xbf16>
    %cst_14 = arith.constant dense<0.000000e+00> : vector<8x32xf32>
    %18 = tpu.matmul %15, %17, %cst_14 {dimension_numbers = #tpu.dot_dimension_numbers<[1], [0], [0], [1], [0, 0, 1, 1], [], []>} : vector<8x32xbf16>, vector<32x32xbf16>, vector<8x32xf32> -> vector<8x32xf32>
    %cst_15 = arith.constant 0.000000e+00 : f32
    %19 = vector.broadcast %cst_15 : f32 to vector<8x32xf32>
    %20 = arith.maximumf %18, %19 : vector<8x32xf32>
    %c1_16 = arith.constant 1 : index
    %c0_17 = arith.constant 0 : index
    %c0_18 = arith.constant 0 : index
    %21 = vector.load %arg4[%c1_16, %c0_17, %c0_18] : memref<4x8x4xf32, #tpu.memory_space<vmem>>, vector<1x8x4xf32>
    %22 = vector.shape_cast %21 : vector<1x8x4xf32> to vector<8x4xf32>
    %23 = vector.shape_cast %22 : vector<8x4xf32> to vector<8x4x1xf32>
    %24 = vector.shape_cast %20 : vector<8x32xf32> to vector<8x1x32xf32>
    %25 = vector.broadcast %23 : vector<8x4x1xf32> to vector<8x4x32xf32>
    %26 = vector.broadcast %24 : vector<8x1x32xf32> to vector<8x4x32xf32>
    %27 = arith.mulf %25, %26 : vector<8x4x32xf32>
    %28 = arith.addf %13, %27 : vector<8x4x32xf32>
    %c2 = arith.constant 2 : index
    %c0_19 = arith.constant 0 : index
    %c0_20 = arith.constant 0 : index
    %29 = vector.load %arg2[%c2, %c0_19, %c0_20] : memref<4x8x32xbf16, #tpu.memory_space<vmem>>, vector<1x8x32xbf16>
    %30 = vector.shape_cast %29 : vector<1x8x32xbf16> to vector<8x32xbf16>
    %c2_21 = arith.constant 2 : index
    %c0_22 = arith.constant 0 : index
    %c0_23 = arith.constant 0 : index
    %31 = vector.load %arg3[%c2_21, %c0_22, %c0_23] : memref<4x32x32xbf16, #tpu.memory_space<vmem>>, vector<1x32x32xbf16>
    %32 = vector.shape_cast %31 : vector<1x32x32xbf16> to vector<32x32xbf16>
    %cst_24 = arith.constant dense<0.000000e+00> : vector<8x32xf32>
    %33 = tpu.matmul %30, %32, %cst_24 {dimension_numbers = #tpu.dot_dimension_numbers<[1], [0], [0], [1], [0, 0, 1, 1], [], []>} : vector<8x32xbf16>, vector<32x32xbf16>, vector<8x32xf32> -> vector<8x32xf32>
    %cst_25 = arith.constant 0.000000e+00 : f32
    %34 = vector.broadcast %cst_25 : f32 to vector<8x32xf32>
    %35 = arith.maximumf %33, %34 : vector<8x32xf32>
    %c2_26 = arith.constant 2 : index
    %c0_27 = arith.constant 0 : index
    %c0_28 = arith.constant 0 : index
    %36 = vector.load %arg4[%c2_26, %c0_27, %c0_28] : memref<4x8x4xf32, #tpu.memory_space<vmem>>, vector<1x8x4xf32>
    %37 = vector.shape_cast %36 : vector<1x8x4xf32> to vector<8x4xf32>
    %38 = vector.shape_cast %37 : vector<8x4xf32> to vector<8x4x1xf32>
    %39 = vector.shape_cast %35 : vector<8x32xf32> to vector<8x1x32xf32>
    %40 = vector.broadcast %38 : vector<8x4x1xf32> to vector<8x4x32xf32>
    %41 = vector.broadcast %39 : vector<8x1x32xf32> to vector<8x4x32xf32>
    %42 = arith.mulf %40, %41 : vector<8x4x32xf32>
    %43 = arith.addf %28, %42 : vector<8x4x32xf32>
    %c3 = arith.constant 3 : index
    %c0_29 = arith.constant 0 : index
    %c0_30 = arith.constant 0 : index
    %44 = vector.load %arg2[%c3, %c0_29, %c0_30] : memref<4x8x32xbf16, #tpu.memory_space<vmem>>, vector<1x8x32xbf16>
    %45 = vector.shape_cast %44 : vector<1x8x32xbf16> to vector<8x32xbf16>
    %c3_31 = arith.constant 3 : index
    %c0_32 = arith.constant 0 : index
    %c0_33 = arith.constant 0 : index
    %46 = vector.load %arg3[%c3_31, %c0_32, %c0_33] : memref<4x32x32xbf16, #tpu.memory_space<vmem>>, vector<1x32x32xbf16>
    %47 = vector.shape_cast %46 : vector<1x32x32xbf16> to vector<32x32xbf16>
    %cst_34 = arith.constant dense<0.000000e+00> : vector<8x32xf32>
    %48 = tpu.matmul %45, %47, %cst_34 {dimension_numbers = #tpu.dot_dimension_numbers<[1], [0], [0], [1], [0, 0, 1, 1], [], []>} : vector<8x32xbf16>, vector<32x32xbf16>, vector<8x32xf32> -> vector<8x32xf32>
    %cst_35 = arith.constant 0.000000e+00 : f32
    %49 = vector.broadcast %cst_35 : f32 to vector<8x32xf32>
    %50 = arith.maximumf %48, %49 : vector<8x32xf32>
    %c3_36 = arith.constant 3 : index
    %c0_37 = arith.constant 0 : index
    %c0_38 = arith.constant 0 : index
    %51 = vector.load %arg4[%c3_36, %c0_37, %c0_38] : memref<4x8x4xf32, #tpu.memory_space<vmem>>, vector<1x8x4xf32>
    %52 = vector.shape_cast %51 : vector<1x8x4xf32> to vector<8x4xf32>
    %53 = vector.shape_cast %52 : vector<8x4xf32> to vector<8x4x1xf32>
    %54 = vector.shape_cast %50 : vector<8x32xf32> to vector<8x1x32xf32>
    %55 = vector.broadcast %53 : vector<8x4x1xf32> to vector<8x4x32xf32>
    %56 = vector.broadcast %54 : vector<8x1x32xf32> to vector<8x4x32xf32>
    %57 = arith.mulf %55, %56 : vector<8x4x32xf32>
    %58 = arith.addf %43, %57 : vector<8x4x32xf32>
    %c0_i32 = arith.constant 0 : i32
    %59 = arith.cmpi eq, %arg1, %c0_i32 : i32
    %60 = arith.extui %59 : i1 to i32
    %c0_i32_39 = arith.constant 0 : i32
    %61 = arith.cmpi ne, %60, %c0_i32_39 : i32
    scf.if %61 {
      %c0_42 = arith.constant 0 : index
      %c0_43 = arith.constant 0 : index
      %c0_44 = arith.constant 0 : index
      %65 = vector.load %arg5[%c0_42, %c0_43, %c0_44] : memref<8x4x32xf32, #tpu.memory_space<vmem>>, vector<8x4x32xf32>
      tpu.vector_store %arg5[%c0_42, %c0_43, %c0_44], %58 {strides = array<i32>} : memref<8x4x32xf32, #tpu.memory_space<vmem>>, vector<8x4x32xf32>,
    } else {
    }
    %c0_i32_40 = arith.constant 0 : i32
    %62 = arith.cmpi ne, %arg1, %c0_i32_40 : i32
    %63 = arith.extui %62 : i1 to i32
    %c0_i32_41 = arith.constant 0 : i32
    %64 = arith.cmpi ne, %63, %c0_i32_41 : i32
    scf.if %64 {
      %c0_42 = arith.constant 0 : index
      %c0_43 = arith.constant 0 : index
      %c0_44 = arith.constant 0 : index
      %65 = vector.load %arg5[%c0_42, %c0_43, %c0_44] : memref<8x4x32xf32, #tpu.memory_space<vmem>>, vector<8x4x32xf32>
      %66 = arith.addf %65, %58 : vector<8x4x32xf32>
      %c0_45 = arith.constant 0 : index
      %c0_46 = arith.constant 0 : index
      %c0_47 = arith.constant 0 : index
      %67 = vector.load %arg5[%c0_45, %c0_46, %c0_47] : memref<8x4x32xf32, #tpu.memory_space<vmem>>, vector<8x4x32xf32>
      tpu.vector_store %arg5[%c0_45, %c0_46, %c0_47], %66 {strides = array<i32>} : memref<8x4x32xf32, #tpu.memory_space<vmem>>, vector<8x4x32xf32>,
    } else {
    }
    return
  }
  func.func @transform_0(%arg0: i32, %arg1: i32) -> (i32, i32, i32) {
    %c0_i32 = arith.constant 0 : i32
    %c0_i32_0 = arith.constant 0 : i32
    return %arg1, %arg0, %c0_i32 : i32, i32, i32
  }
  func.func @transform_1(%arg0: i32, %arg1: i32) -> (i32, i32, i32) {
    %c0_i32 = arith.constant 0 : i32
    %c0_i32_0 = arith.constant 0 : i32
    %c0_i32_1 = arith.constant 0 : i32
    return %arg1, %c0_i32, %c0_i32_0 : i32, i32, i32
  }
  func.func @transform_2(%arg0: i32, %arg1: i32) -> (i32, i32, i32) {
    %c0_i32 = arith.constant 0 : i32
    %c0_i32_0 = arith.constant 0 : i32
    return %arg1, %arg0, %c0_i32 : i32, i32, i32
  }
  func.func @transform_3(%arg0: i32, %arg1: i32) -> (i32, i32, i32) {
    %c0_i32 = arith.constant 0 : i32
    %c0_i32_0 = arith.constant 0 : i32
    %c0_i32_1 = arith.constant 0 : i32
    return %arg0, %c0_i32, %c0_i32_0 : i32, i32, i32
  }
}

</mosaic_0001>

<bundles_post_ra>
// kernel: tpu_custom_call.1
= control target key start
LH: loop header
LB: loop body
LE: loop exit
PB: predicated region body
PF: predicated region fallthrough
CT: control target
= control target key end

     0   :  { %8 = vsyncpa [#allocation3], 0  ;;  %s1439_s0 = inlined_call_operand.vmem [shape: bf16[4,8,32], index: 0, kind: input, shape index: {}]   ;;  %s1440_s1 = inlined_call_operand.hbm [shape: bf16[4,32,32], index: 1, kind: input, shape index: {}]   ;;  %s1441_s2 = inlined_call_operand.vmem [shape: f32[4,8,4], index: 2, kind: input, shape index: {}]   ;;  %s1442_s3 = inlined_call_operand.hbm [shape: f32[8,4,32], index: 3, kind: output, shape index: {}]  }
   0x1   :  { %9 = vsyncpa [#allocation4], 0  ;;  %s1112_s12 = smov [#allocation2]   ;;  %s1064_s16 = scalar_lea.hbm %s1440_s1, 1024 }
   0x2   :  { %s17_s13 = sshll.u32 %s1112_s12, 4  ;;  %p1065_p0 = scmp.ne.s32.totalorder %s1440_s1, %s1064_s16  ;;  %s18_s13 = int_to_ptr.vmem [resolvable:$true] %s17_s13 }
   0x3   :  { %p1068_p1 = scmp.lt.u32.totalorder %s1064_s16, %s1440_s1 }
   0x5   :  { %p1070_p2 = pnand %p1068_p1, %p1065_p0 }
   0x7   :  { %1073 = shalt.err (!%p1070_p2)
}
   0x8   :  { %s1074_s21 = scalar_lea.vmem %s18_s13, 1024  ;;  %p1079_p4 = scmp.lt.s32.totalorder %s18_s13, %s18_s13 }
   0x9   :  { %p1075_p3 = scmp.ne.s32.totalorder %s18_s13, %s1074_s21  ;;  %p1080_p5 = scmp.lt.s32.totalorder %s1074_s21, %s1074_s21 }
   0xb   :  { %p1081_p6 = por %p1080_p5, %p1079_p4 }
   0xd   :  { %p1082_p7 = pnand %p1081_p6, %p1075_p3 }
   0xf   :  { %1085 = shalt.err (!%p1082_p7)
}
  0x10   :  { %s1113_s22 = smov 64   ;;  %s1114_s23 = smov 4  }
  0x11   :  { %23 = dma.hbm_to_vmem [thread:$0]  %s1440_s1, 1024, %s18_s13, [#allocation3], %s1113_s22, %s1113_s22, %s1114_s23  }
  0x12   :  { %1108 = dma.done.wait [#allocation3], 1024  }
  0x13   :  { %1109 = vsyncadd [#allocation3], 4294966272  ;;  %v1115_v0 = vmov 0.0   ;;  %vm1116_vm0 = vmmov 0   ;;  %v93_v1 = vlaneseq  ;;  %v1056_v2 = vld [vmem:[#allocation2] sm:$0xff]   ;;  %v1057_v4 = vld [vmem:[#allocation2 + $0x10] sm:$0xff]  }
  0x14   :  { %1017 = vmatprep.subr.bf16.mxu0 %v1115_v0  ;;  %1025 = vmatprep.subr.bf16.mxu1 %v1115_v0  ;;  %v1058_v5 = vld [vmem:[#allocation2 + $0x8] sm:$0xff]   ;;  %v1059_v6 = vld [vmem:[#allocation2 + $0x18] sm:$0xff]   ;;  %v30_v7 = vld [vmem:[%s1439_s0] sm:$0xf]  ;;  %vm47_vm1 = vcmask 261120   ;;  %vm932_vm2 = vcmask 257024  }
  0x15   :  { %1021 = vmatprep.mubr.msk.bf16.mxu0 %vm1116_vm0, %v1115_v0  ;;  %1029 = vmatprep.mubr.msk.bf16.mxu1 %vm1116_vm0, %v1115_v0  ;;  %v1156_v3 = vshrl.u32 %v93_v1, 7  ;;  %v990_v9 = vld [vmem:[%s1439_s0 + $0x4] sm:$0xf]  ;;  %v1061_v12 = vld [vmem:[#allocation2 + $0x30] sm:$0xff]   ;;  %v1062_v15 = vld [vmem:[#allocation2 + $0x28] sm:$0xff]  }
  0x16   :  { %1018 = vmatpush3.bf16.msra.mxu0 %v1056_v2  ;;  %1026 = vmatpush3.bf16.msra.mxu1 %v1057_v4  ;;  %v1060_v10 = vld [vmem:[#allocation2 + $0x20] sm:$0xff]   ;;  %v1063_v19 = vld [vmem:[#allocation2 + $0x38] sm:$0xff]   ;;  %v995_v22 = vld [vmem:[%s1439_s0 + $0x8] sm:$0xf] }
  0x17   :  { %1019 = vmatprep.subr.bf16.mxu0 %v1115_v0  ;;  %1027 = vmatprep.subr.bf16.mxu1 %v1115_v0  ;;  %v1162_v8 = vsub.s32 0, %v1156_v3  ;;  %v1168_v11 = vsub.s32 2, %v1156_v3  ;;  %v92_v13 = vld [vmem:[%s1441_s2] sm:$0xff]  ;;  %v1175_v14 = vsub.s32 1, %v1156_v3  ;;  %v1181_v18 = vsub.s32 3, %v1156_v3  ;;  %v994_v32 = vld [vmem:[%s1441_s2 + $0x8] sm:$0xff] }
  0x18   :  { %v1187_v21 = vsub.s32 4, %v1156_v3  ;;  %v1194_v24 = vsub.s32 5, %v1156_v3  ;;  %v1000_v25 = vld [vmem:[%s1439_s0 + $0xc] sm:$0xf]  ;;  %v137_v27 = vsub.s32 6, %v1156_v3  ;;  %v144_v29 = vsub.s32 7, %v1156_v3 }
  0x19   :  { %v96_v16 = vrot.slane %v92_v13, %v1162_v8  ;;  %v110_v17 = vrot.slane %v92_v13, %v1168_v11  ;;  %v103_v20 = vrot.slane %v92_v13, %v1175_v14  ;;  %v117_v23 = vrot.slane %v92_v13, %v1181_v18  ;;  %v999_v41 = vld [vmem:[%s1441_s2 + $0x10] sm:$0xff]  ;;  %v1004_v50 = vld [vmem:[%s1441_s2 + $0x18] sm:$0xff]  ;;  %s1118_s2 = smov [#allocation5]  }
  0x1a   :  { %1020 = vmatpush3.bf16.msra.mxu0 %v1058_v5  ;;  %1028 = vmatpush3.bf16.msra.mxu1 %v1059_v6  ;;  %v124_v26 = vrot.slane %v92_v13, %v1187_v21  ;;  %v131_v28 = vrot.slane %v92_v13, %v1194_v24  ;;  %v138_v30 = vrot.slane %v92_v13, %v137_v27  ;;  %s975_s13 = sshll.u32 %s1118_s2, 4  ;;  %s976_s13 = int_to_ptr.vmem [resolvable:$true] %s975_s13 }
  0x1b   :  { %1033 = vmatprep.subr.bf16.mxu0 %v1115_v0  ;;  %1041 = vmatprep.subr.bf16.mxu1 %v1115_v0  ;;  %v145_v31 = vrot.slane %v92_v13, %v144_v29  ;;  %v315_v33 = vrot.slane %v994_v32, %v1162_v8  ;;  %v322_v34 = vrot.slane %v994_v32, %v1175_v14  ;;  %s1086_s14 = scalar_lea.vmem %s976_s13, 512  ;;  %p1091_p9 = scmp.lt.s32.totalorder %s976_s13, %s976_s13 }
  0x1c   :  { %98 = vbcast.lane.b32.xlu0 %v96_v16, 256  ;;  %112 = vbcast.lane.b32.xlu1 %v110_v17, 256  ;;  %v329_v35 = vrot.slane %v994_v32, %v1168_v11  ;;  %v336_v36 = vrot.slane %v994_v32, %v1181_v18  ;;  %v343_v37 = vrot.slane %v994_v32, %v1187_v21  ;;  %p1087_p8 = scmp.ne.s32.totalorder %s976_s13, %s1086_s14  ;;  %p1092_p10 = scmp.lt.s32.totalorder %s1086_s14, %s1086_s14 }
  0x1d   :  { %1022 = vmatmul.mubr.msk.bf16.vlgmr.msra.gmra.mrb[0].mxu0 %vm47_vm1, %v30_v7  ;;  %1030 = vmatmul.mubr.msk.bf16.vlgmr.msra.gmra.mrb[0].mxu1 %vm47_vm1, %v990_v9  ;;  %v350_v38 = vrot.slane %v994_v32, %v1194_v24  ;;  %v357_v39 = vrot.slane %v994_v32, %v137_v27  ;;  %v364_v40 = vrot.slane %v994_v32, %v144_v29 }
  0x1e   :  { %1034 = vmatpush3.bf16.msra.mxu0 %v1060_v10  ;;  %1042 = vmatpush3.bf16.msra.mxu1 %v1061_v12  ;;  %v542_v42 = vrot.slane %v999_v41, %v1162_v8  ;;  %v549_v43 = vrot.slane %v999_v41, %v1175_v14  ;;  %v556_v44 = vrot.slane %v999_v41, %v1168_v11  ;;  %p1093_p11 = por %p1092_p10, %p1091_p9 }
  0x1f   :  { %1035 = vmatprep.subr.bf16.mxu0 %v1115_v0  ;;  %1043 = vmatprep.subr.bf16.mxu1 %v1115_v0  ;;  %v563_v45 = vrot.slane %v999_v41, %v1181_v18  ;;  %v570_v46 = vrot.slane %v999_v41, %v1187_v21  ;;  %v577_v47 = vrot.slane %v999_v41, %v1194_v24 }
  0x20   :  { %1037 = vmatprep.mubr.msk.bf16.mxu0 %vm1116_vm0, %v1115_v0  ;;  %1045 = vmatprep.mubr.msk.bf16.mxu1 %vm1116_vm0, %v1115_v0  ;;  %v584_v48 = vrot.slane %v999_v41, %v137_v27  ;;  %v591_v49 = vrot.slane %v999_v41, %v144_v29  ;;  %v769_v51 = vrot.slane %v1004_v50, %v1162_v8  ;;  %p1094_p12 = pnand %p1093_p11, %p1087_p8 }
  0x21   :  { %105 = vbcast.lane.b32.xlu0 %v103_v20, 256  ;;  %119 = vbcast.lane.b32.xlu1 %v117_v23, 256  ;;  %v776_v52 = vrot.slane %v1004_v50, %v1175_v14  ;;  %v783_v53 = vrot.slane %v1004_v50, %v1168_v11  ;;  %v790_v54 = vrot.slane %v1004_v50, %v1181_v18  ;;  %v1117_v14 = vmov 1966171168  }
  0x22   :  { %1036 = vmatpush3.bf16.msra.mxu0 %v1062_v15  ;;  %1044 = vmatpush3.bf16.msra.mxu1 %v1063_v19  ;;  %v797_v55 = vrot.slane %v1004_v50, %v1187_v21  ;;  %v804_v56 = vrot.slane %v1004_v50, %v1194_v24  ;;  %v811_v57 = vrot.slane %v1004_v50, %v137_v27  ;;  %v152_v15 = vunpack.c.l.s4 %v1117_v14 }
  0x23   :  { %v818_v58 = vrot.slane %v1004_v50, %v144_v29 }
  0x24   :  { %v153_v18 = vunpack.c.0.s8 %v152_v15 }
  0x25   :  { %1038 = vmatmul.mubr.msk.bf16.vlgmr.msra.gmra.mrb[4].mxu0 %vm47_vm1, %v995_v22  ;;  %1046 = vmatmul.mubr.msk.bf16.vlgmr.msra.gmra.mrb[4].mxu1 %vm47_vm1, %v1000_v25 }
  0x26   :  { %126 = vbcast.lane.b32.xlu0 %v124_v26, 256  ;;  %133 = vbcast.lane.b32.xlu1 %v131_v28, 256  ;;  %v1271_v19 = vsub.s32 %v153_v18, %v1156_v3 }
  0x2a   :  { %140 = vbcast.lane.b32.xlu0 %v138_v30, 256  ;;  %147 = vbcast.lane.b32.xlu1 %v145_v31, 256 }
  0x2e   :  { %317 = vbcast.lane.b32.xlu0 %v315_v33, 256  ;;  %324 = vbcast.lane.b32.xlu1 %v322_v34, 256 }
  0x32   :  { %331 = vbcast.lane.b32.xlu0 %v329_v35, 256  ;;  %338 = vbcast.lane.b32.xlu1 %v336_v36, 256 }
  0x36   :  { %345 = vbcast.lane.b32.xlu0 %v343_v37, 256  ;;  %352 = vbcast.lane.b32.xlu1 %v350_v38, 256 }
  0x3a   :  { %359 = vbcast.lane.b32.xlu0 %v357_v39, 256  ;;  %366 = vbcast.lane.b32.xlu1 %v364_v40, 256 }
  0x3e   :  { %544 = vbcast.lane.b32.xlu0 %v542_v42, 256  ;;  %551 = vbcast.lane.b32.xlu1 %v549_v43, 256 }
  0x42   :  { %558 = vbcast.lane.b32.xlu0 %v556_v44, 256  ;;  %565 = vbcast.lane.b32.xlu1 %v563_v45, 256 }
  0x46   :  { %572 = vbcast.lane.b32.xlu0 %v570_v46, 256  ;;  %579 = vbcast.lane.b32.xlu1 %v577_v47, 256 }
  0x4a   :  { %586 = vbcast.lane.b32.xlu0 %v584_v48, 256  ;;  %593 = vbcast.lane.b32.xlu1 %v591_v49, 256 }
  0x4e   :  { %771 = vbcast.lane.b32.xlu0 %v769_v51, 256  ;;  %778 = vbcast.lane.b32.xlu1 %v776_v52, 256 }
  0x52   :  { %785 = vbcast.lane.b32.xlu0 %v783_v53, 256  ;;  %792 = vbcast.lane.b32.xlu1 %v790_v54, 256 }
  0x56   :  { %799 = vbcast.lane.b32.xlu0 %v797_v55, 256  ;;  %806 = vbcast.lane.b32.xlu1 %v804_v56, 256 }
  0x5a   :  { %813 = vbcast.lane.b32.xlu0 %v811_v57, 256  ;;  %820 = vbcast.lane.b32.xlu1 %v818_v58, 256 }
  0x8e   :  { %v1232_v59 = vpop.permute.xlu0 %98  ;;  %v1234_v60 = vpop.permute.xlu1 %112 }
  0x93   :  { %v1236_v61 = vpop.permute.xlu0 %105  ;;  %v1238_v62 = vpop.permute.xlu1 %119 }
  0x98   :  { %v1240_v63 = vpop.permute.xlu0 %126  ;;  %v1242_v0 = vpop.permute.xlu1 %133 }
  0x9c   :  { %v1244_v1 = vpop.permute.xlu0 %140  ;;  %v1246_v2 = vpop.permute.xlu1 %147 }
  0xa0   :  { %v1248_v4 = vpop.permute.xlu0 %317  ;;  %v1250_v5 = vpop.permute.xlu1 %324 }
  0xa4   :  { %v1252_v6 = vpop.permute.xlu0 %331  ;;  %v1254_v7 = vpop.permute.xlu1 %338 }
  0xa8   :  { %v1256_v9 = vpop.permute.xlu0 %345  ;;  %v1258_v10 = vpop.permute.xlu1 %352 }
  0xac   :  { %v1260_v11 = vpop.permute.xlu0 %359  ;;  %v1262_v12 = vpop.permute.xlu1 %366 }
  0xb0   :  { %v1264_v13 = vpop.permute.xlu0 %544  ;;  %v1266_v16 = vpop.permute.xlu1 %551 }
  0xb4   :  { %v1268_v17 = vpop.permute.xlu0 %558  ;;  %v1273_v20 = vpop.permute.xlu1 %565 }
  0xb8   :  { %v1275_v22 = vpop.permute.xlu0 %572  ;;  %v1287_v45 = vpop.permute.xlu1 %579 }
  0xbc   :  { %v1293_v50 = vpop.permute.xlu0 %586 }
  0xf0   :  { %v85_v21 = vpop.f32.mrb[0].mxu0  ;;  %v303_v23 = vpop.f32.mrb[0].mxu1 }
  0xf1   :  { %v91_v24 = vmax.f32 %v85_v21, 0.0  ;;  %v1023_v25 = vpop.f32.mrb[1].mxu0  ;;  %v309_v26 = vmax.f32 %v303_v23, 0.0  ;;  %v1031_v27 = vpop.f32.mrb[1].mxu1 }
  0xf2   :  { %v88_v28 = vpop.f32.mrb[2].mxu0  ;;  %v306_v31 = vpop.f32.mrb[2].mxu1 }
  0xf3   :  { %v150_v29 = vcombine.high %v91_v24, %v91_v24  ;;  %v157_v30 = vrot.slane %v91_v24, %v1271_v19  ;;  %v1024_v32 = vpop.f32.mrb[3].mxu0  ;;  %v369_v33 = vcombine.high %v309_v26, %v309_v26  ;;  %v376_v3 = vrot.slane %v309_v26, %v1271_v19  ;;  %v1032_v34 = vpop.f32.mrb[3].mxu1 }
  0xf5   :  { %v164_v35 = vrot.slane %v150_v29, %v1271_v19  ;;  %v165_v36 = vcombine.high %v157_v30, %v157_v30  ;;  %v173_v37 = vrot.slane %v157_v30, %v1271_v19  ;;  %v383_v38 = vrot.slane %v369_v33, %v1271_v19 }
  0xf6   :  { %v384_v39 = vcombine.high %v376_v3, %v376_v3  ;;  %v392_v40 = vrot.slane %v376_v3, %v1271_v19 }
  0xf7   :  { %v166_v41 = vcombine.high %v164_v35, %v164_v35  ;;  %v1284_v42 = vrot.slane %v164_v35, %v1271_v19  ;;  %v187_v43 = vrot.slane %v165_v36, %v1271_v19  ;;  %v195_v44 = vcombine.high %v173_v37, %v173_v37  ;;  %v1319_v35 = vpop.permute.xlu1 %593 }
  0xf8   :  { %v385_v46 = vcombine.high %v383_v38, %v383_v38  ;;  %v1290_v47 = vrot.slane %v383_v38, %v1271_v19  ;;  %v406_v48 = vrot.slane %v384_v39, %v1271_v19  ;;  %v414_v49 = vcombine.high %v392_v40, %v392_v40  ;;  %v530_v51 = vpop.f32.mrb[4].mxu0  ;;  %v757_v56 = vpop.f32.mrb[4].mxu1 }
  0xf9   :  { %v421_v52 = vrot.slane %v392_v40, %v1162_v8  ;;  %v1297_v53 = vrot.slane %v166_v41, %v1271_v19  ;;  %v196_v54 = vcombine.high %v1284_v42, %v1284_v42  ;;  %v197_v55 = vcombine.high %v187_v43, %v187_v43  ;;  %v1039_v57 = vpop.f32.mrb[5].mxu0  ;;  %v1047_v21 = vpop.f32.mrb[5].mxu1 }
  0xfa   :  { %v1302_v58 = vrot.slane %v385_v46, %v1271_v19  ;;  %v415_v14 = vcombine.high %v1290_v47, %v1290_v47  ;;  %v416_v15 = vcombine.high %v406_v48, %v406_v48  ;;  %v425_v18 = vrot.slane %v406_v48, %v1162_v8  ;;  %v533_v23 = vpop.f32.mrb[6].mxu0  ;;  %v760_v28 = vpop.f32.mrb[6].mxu1 }
  0xfb   :  { %v429_v24 = vrot.slane %v414_v49, %v1162_v8  ;;  %v437_v25 = vrot.slane %v1290_v47, %v1162_v8  ;;  %v198_v26 = vcombine.high %v1297_v53, %v1297_v53  ;;  %v202_v27 = vrot.slane %v173_v37, %v1162_v8  ;;  %v1040_v29 = vpop.f32.mrb[7].mxu0  ;;  %v1048_v3 = vpop.f32.mrb[7].mxu1 }
  0xfc   :  { %v417_v30 = vcombine.high %v1302_v58, %v1302_v58  ;;  %v206_v31 = vrot.slane %v187_v43, %v1162_v8  ;;  %v210_v32 = vrot.slane %v195_v44, %v1162_v8  ;;  %v218_v33 = vrot.slane %v1284_v42, %v1162_v8  ;;  %v779_v29 = vpop.permute.xlu1 %778 }
  0xfd   :  { %v763_v34 = vmax.f32 %v757_v56, 0.0  ;;  %v536_v36 = vmax.f32 %v530_v51, 0.0  ;;  %v458_v38 = vmul.f32 %v421_v52, %v1248_v4  ;;  %v239_v37 = vmul.f32 %v202_v27, %v1232_v59  ;;  %v772_v56 = vpop.permute.xlu0 %771 }
  0xfe   :  { %v459_v39 = vmul.f32 %v425_v18, %v1250_v5  ;;  %v240_v40 = vmul.f32 %v206_v31, %v1236_v61  ;;  %v460_v41 = vmul.f32 %v429_v24, %v1252_v6  ;;  %v241_v43 = vmul.f32 %v210_v32, %v1234_v60 }
  0xff   :  { %v823_v44 = vcombine.high %v763_v34, %v763_v34  ;;  %v830_v46 = vrot.slane %v763_v34, %v1271_v19  ;;  %v596_v48 = vcombine.high %v536_v36, %v536_v36  ;;  %v603_v49 = vrot.slane %v536_v36, %v1271_v19 }
 0x100   :  { %v466_v51 = vadd.f32 %v458_v38, %v239_v37  ;;  %v467_v57 = vadd.f32 %v459_v39, %v240_v40  ;;  %v468_v4 = vadd.f32 %v460_v41, %v241_v43  ;;  %v433_v59 = vrot.slane %v416_v15, %v1162_v8 }
 0x101   :  { %v1331_v5 = vrot.slane %v823_v44, %v1271_v19  ;;  %v838_v61 = vcombine.high %v830_v46, %v830_v46  ;;  %v610_v6 = vrot.slane %v596_v48, %v1271_v19  ;;  %v611_v52 = vcombine.high %v603_v49, %v603_v49  ;;  %v786_v37 = vpop.permute.xlu0 %785 }
 0x102   :  { %v619_v60 = vrot.slane %v603_v49, %v1271_v19  ;;  %v846_v18 = vrot.slane %v830_v46, %v1271_v19  ;;  %v461_v21 = vmul.f32 %v433_v59, %v1254_v7  ;;  %v214_v23 = vrot.slane %v197_v55, %v1162_v8 }
 0x103   :  { %v612_v24 = vcombine.high %v610_v6, %v610_v6  ;;  %v1339_v27 = vrot.slane %v610_v6, %v1271_v19  ;;  %v633_v15 = vrot.slane %v611_v52, %v1271_v19  ;;  %v860_v28 = vrot.slane %v838_v61, %v1271_v19 }
 0x104   :  { %v641_v31 = vcombine.high %v619_v60, %v619_v60  ;;  %v648_v32 = vrot.slane %v619_v60, %v1162_v8  ;;  %v875_v3 = vrot.slane %v846_v18, %v1162_v8  ;;  %v868_v34 = vcombine.high %v846_v18, %v846_v18 }
 0x105   :  { %v1346_v36 = vrot.slane %v612_v24, %v1271_v19  ;;  %v642_v7 = vcombine.high %v1339_v27, %v1339_v27  ;;  %v643_v55 = vcombine.high %v633_v15, %v633_v15  ;;  %v879_v38 = vrot.slane %v860_v28, %v1162_v8 }
 0x106   :  { %v685_v39 = vmul.f32 %v648_v32, %v1264_v13  ;;  %v912_v40 = vmul.f32 %v875_v3, %v772_v56  ;;  %v652_v41 = vrot.slane %v633_v15, %v1162_v8  ;;  %v883_v43 = vrot.slane %v868_v34, %v1162_v8  ;;  %v793_v56 = vpop.permute.xlu1 %792 }
 0x107   :  { %v913_v44 = vmul.f32 %v879_v38, %v779_v29  ;;  %v656_v46 = vrot.slane %v641_v31, %v1162_v8  ;;  %v870_v48 = vcombine.high %v860_v28, %v860_v28  ;;  %v242_v49 = vmul.f32 %v214_v23, %v1238_v62  ;;  %v800_v29 = vpop.permute.xlu0 %799 }
 0x108   :  { %v693_v59 = vadd.f32 %v685_v39, %v466_v51  ;;  %v686_v61 = vmul.f32 %v652_v41, %v1266_v16  ;;  %v914_v6 = vmul.f32 %v883_v43, %v786_v37  ;;  %v660_v52 = vrot.slane %v643_v55, %v1162_v8 }
 0x109   :  { %v687_v60 = vmul.f32 %v656_v46, %v1268_v17  ;;  %v887_v13 = vrot.slane %v870_v48, %v1162_v8  ;;  %v469_v18 = vadd.f32 %v461_v21, %v242_v49  ;;  %v462_v24 = vmul.f32 %v437_v25, %v1256_v9 }
 0x10a   :  { %v920_v15 = vadd.f32 %v912_v40, %v693_v59  ;;  %v694_v28 = vadd.f32 %v686_v61, %v467_v57  ;;  %v688_v62 = vmul.f32 %v660_v52, %v1273_v20  ;;  %v853_v16 = vrot.slane %v1331_v5, %v1271_v19  ;;  %v807_v37 = vpop.permute.xlu1 %806 }
 0x10b   :  { %v695_v51 = vadd.f32 %v687_v60, %v468_v4  ;;  %v915_v23 = vmul.f32 %v887_v13, %v793_v56  ;;  %v243_v17 = vmul.f32 %v218_v33, %v1240_v63  ;;  %v664_v21 = vrot.slane %v1339_v27, %v1162_v8 }
 0x10c   :  { %933 = vst.msk [vmem:[#allocation5] sm:$0xf] %vm932_vm2, %v920_v15  ;;  %v921_v9 = vadd.f32 %v913_v44, %v694_v28  ;;  %v696_v25 = vadd.f32 %v688_v62, %v469_v18  ;;  %v891_v20 = vrot.slane %v853_v16, %v1162_v8  ;;  %v441_v57 = vrot.slane %v1302_v58, %v1162_v8 }
 0x10d   :  { %v922_v4 = vadd.f32 %v914_v6, %v695_v51  ;;  %v470_v31 = vadd.f32 %v462_v24, %v243_v17  ;;  %v689_v32 = vmul.f32 %v664_v21, %v1275_v22  ;;  %v839_v3 = vcombine.high %v1331_v5, %v1331_v5 }
 0x10e   :  { %934 = vst.msk [vmem:[#allocation5 + $0x4] sm:$0xf] %vm932_vm2, %v921_v9  ;;  %v923_v63 = vadd.f32 %v915_v23, %v696_v25  ;;  %v916_v33 = vmul.f32 %v891_v20, %v800_v29  ;;  %v463_v27 = vmul.f32 %v441_v57, %v1258_v10  ;;  %v222_v34 = vrot.slane %v1297_v53, %v1162_v8  ;;  %v821_v52 = vpop.permute.xlu1 %820 }
 0x10f   :  { %935 = vst.msk [vmem:[#allocation5 + $0x8] sm:$0xf] %vm932_vm2, %v922_v4  ;;  %v697_v55 = vadd.f32 %v689_v32, %v470_v31  ;;  %v867_v38 = vrot.slane %v839_v3, %v1271_v19  ;;  %v668_v22 = vrot.slane %v1346_v36, %v1162_v8  ;;  %v445_v5 = vrot.slane %v415_v14, %v1162_v8  ;;  %v814_v14 = vpop.permute.xlu0 %813 }
 0x110   :  { %936 = vst.msk [vmem:[#allocation5 + $0xc] sm:$0xf] %vm932_vm2, %v923_v63  ;;  %v244_v10 = vmul.f32 %v222_v34, %v1242_v0  ;;  %v869_v39 = vcombine.high %v853_v16, %v853_v16  ;;  %v226_v40 = vrot.slane %v196_v54, %v1162_v8  ;;  %v672_v19 = vrot.slane %v642_v7, %v1162_v8 }
 0x111   :  { %v924_v41 = vadd.f32 %v916_v33, %v697_v55  ;;  %v895_v43 = vrot.slane %v867_v38, %v1162_v8  ;;  %v690_v44 = vmul.f32 %v668_v22, %v1287_v45  ;;  %v464_v47 = vmul.f32 %v445_v5, %v1260_v11 }
 0x112   :  { %v471_v46 = vadd.f32 %v463_v27, %v244_v10  ;;  %v899_v48 = vrot.slane %v869_v39, %v1162_v8  ;;  %v245_v0 = vmul.f32 %v226_v40, %v1244_v1  ;;  %v691_v49 = vmul.f32 %v672_v19, %v1293_v50 }
 0x113   :  { %937 = vst.msk [vmem:[#allocation5 + $0x10] sm:$0xf] %vm932_vm2, %v924_v41  ;;  %v917_v42 = vmul.f32 %v895_v43, %v807_v37  ;;  %v449_v54 = vrot.slane %v417_v30, %v1162_v8  ;;  %v871_v7 = vcombine.high %v867_v38, %v867_v38  ;;  %v230_v11 = vrot.slane %v198_v26, %v1162_v8 }
 0x114   :  { %v698_v45 = vadd.f32 %v690_v44, %v471_v46  ;;  %v472_v59 = vadd.f32 %v464_v47, %v245_v0  ;;  %v918_v61 = vmul.f32 %v899_v48, %v814_v14  ;;  %v644_v1 = vcombine.high %v1346_v36, %v1346_v36 }
 0x115   :  { %v465_v50 = vmul.f32 %v449_v54, %v1262_v12  ;;  %v903_v6 = vrot.slane %v871_v7, %v1162_v8  ;;  %v246_v58 = vmul.f32 %v230_v11, %v1246_v2 }
 0x116   :  { %v925_v30 = vadd.f32 %v917_v42, %v698_v45  ;;  %v699_v60 = vadd.f32 %v691_v49, %v472_v59  ;;  %v676_v13 = vrot.slane %v644_v1, %v1162_v8 }
 0x117   :  { %v473_v56 = vadd.f32 %v465_v50, %v246_v58  ;;  %v919_v18 = vmul.f32 %v903_v6, %v821_v52 }
 0x118   :  { %938 = vst.msk [vmem:[#allocation5 + $0x14] sm:$0xf] %vm932_vm2, %v925_v30  ;;  %v926_v53 = vadd.f32 %v918_v61, %v699_v60  ;;  %v692_v26 = vmul.f32 %v676_v13, %v1319_v35 }
 0x11a   :  { %939 = vst.msk [vmem:[#allocation5 + $0x18] sm:$0xf] %vm932_vm2, %v926_v53  ;;  %v700_v12 = vadd.f32 %v692_v26, %v473_v56 }
 0x11c   :  { %v927_v36 = vadd.f32 %v919_v18, %v700_v12 }
 0x11e   :  { %940 = vst.msk [vmem:[#allocation5 + $0x1c] sm:$0xf] %vm932_vm2, %v927_v36 }
 0x11f   :  { %1097 = shalt.err (!%p1094_p12)
}
 0x120   :  { %s1098_s17 = scalar_lea.hbm %s1442_s3, 512 }
 0x121   :  { %p1099_p13 = scmp.ne.s32.totalorder %s1442_s3, %s1098_s17  ;;  %p1102_p0 = scmp.lt.u32.totalorder %s1098_s17, %s1442_s3 }
 0x123   :  { %p1104_p1 = pnand %p1102_p0, %p1099_p13 }
 0x125   :  { %1107 = shalt.err (!%p1104_p1)
}
 0x126   :  { %981 = dma.vmem_to_hbm [thread:$0]  %s976_s13, 512, %s1442_s3, [#allocation4], %s1113_s22, %s1113_s22, %s1114_s23  }
 0x127   :  { %1110 = dma.done.wait [#allocation4], 512  }
 0x128   :  { %1111 = vsyncadd [#allocation4], 4294966784 }
 0x129   :  { %985 = vsyncpa [#allocation3], 1 }
 0x12a   :  { %986 = vsyncpa [#allocation4], 1 }

</bundles_post_ra>
